<compile_context>
chip_gen: v5e
topology: v5e:2x2
jax: 0.10.0
libtpu: 0.0.40
codegen_flags: <defaults>
</compile_context>

<pallas_src>
import jax
import jax.numpy as jnp
from jax.experimental import pallas as pl
from jax.experimental.pallas import tpu as pltpu


def _spectral_mul_kernel(x_ref, wa_ref, wb_ref, o_ref):
    # Per grid step (one corner, one co-tile, one m-tile, one batch element):
    #   x_ref  : (1, 1, Ci, 2, mt)        re/im of x_ft for this batch element
    #   wa_ref : (1, Ci, 2*co_tile, mt)   rows r=2*o+p, p=0 -> wr, p=1 -> wi
    #   wb_ref : (1, Ci, 2*co_tile, mt)   rows r=2*o+p, p=0 -> -wi, p=1 -> wr
    #   o_ref  : (1, 1, 2*co_tile, mt)    rows r=2*o+p, p=0 -> Re, p=1 -> Im
    ci = x_ref.shape[2]
    rows = o_ref.shape[2]
    mt = o_ref.shape[3]

    def body(i, acc):
        xc = x_ref[0, 0, i]            # (2, mt) -- major-dim dynamic index
        xr = xc[0:1, :]                # (1, mt)
        xi = xc[1:2, :]                # (1, mt)
        wa = wa_ref[0, i]              # (rows, mt)
        wb = wb_ref[0, i]              # (rows, mt)
        # out_re = xr*wr - xi*wi ; out_im = xr*wi + xi*wr, folded into rows.
        return acc + xr * wa + xi * wb

    acc = jax.lax.fori_loop(
        0, ci, body,
        jnp.zeros((rows, mt), jnp.float32),
        unroll=ci if ci <= 8 else 4)
    o_ref[0, 0] = acc


def _choose_tiles(ci, co, mpad):
    """Pick (co_tile, m_tile) so blocks stay lane/sublane dense and VMEM-safe."""
    m_tile = 128
    for cand in (512, 256, 128):
        if mpad % cand == 0:
            m_tile = cand
            break
    co_tile = co

    def w_block_bytes(ct):
        return ci * 2 * ct * m_tile * 4

    def acc_bytes(ct):
        return 2 * ct * m_tile * 4

    # Keep each weight block <= 2 MiB (x2 weights x2 double-buffer ~= 8 MiB,
    # safe even under v7x's smaller VMEM) and the vreg accumulator <= 64 KiB.
    while w_block_bytes(co_tile) > (2 << 20) or acc_bytes(co_tile) > (64 << 10):
        if co_tile % 2 == 0 and (co_tile // 2) % 4 == 0:
            co_tile //= 2
        else:
            break
    return co_tile, m_tile


def spectral_corner_mul(x_pk, wa, wb):
    """x_pk: (4, B, Ci, 2, Mpad); wa/wb: (4, Ci, 2*Co, Mpad) -> (4, B, 2*Co, Mpad)."""
    c4, b, ci, _two, mpad = x_pk.shape
    rows_total = wa.shape[2]           # 2 * Co
    co = rows_total // 2
    co_tile, m_tile = _choose_tiles(ci, co, mpad)
    grid = (c4, co // co_tile, mpad // m_tile, b)

    x_spec = pl.BlockSpec((1, 1, ci, 2, m_tile),
                          lambda c, ct, mt, bb: (c, bb, 0, 0, mt))
    w_spec = pl.BlockSpec((1, ci, 2 * co_tile, m_tile),
                          lambda c, ct, mt, bb: (c, 0, ct, mt))
    o_spec = pl.BlockSpec((1, 1, 2 * co_tile, m_tile),
                          lambda c, ct, mt, bb: (c, bb, ct, mt))

    flops = 8 * c4 * b * ci * co * mpad           # complex MAC = 8 real flops
    out_elems = c4 * b * rows_total * mpad
    bytes_accessed = 4 * (x_pk.size + wa.size + wb.size + out_elems)

    return pl.pallas_call(
        _spectral_mul_kernel,
        out_shape=jax.ShapeDtypeStruct((c4, b, rows_total, mpad), jnp.float32),
        grid_spec=pltpu.PrefetchScalarGridSpec(
            num_scalar_prefetch=0,
            grid=grid,
            in_specs=[x_spec, w_spec, w_spec],
            out_specs=o_spec),
        compiler_params=pltpu.CompilerParams(
            dimension_semantics=("parallel", "parallel", "parallel", "parallel"),
            vmem_limit_bytes=32 * 1024 * 1024),
        cost_estimate=pl.CostEstimate(flops=flops, transcendentals=0,
                                      bytes_accessed=bytes_accessed),
    )(x_pk, wa, wb)


class SpectralConv3dPallas:
    """JAX/Pallas port of the PyTorch SpectralConv3d module."""

    def __init__(self, in_channels, out_channels, modes1, modes2, modes3, key):
        self.in_channels = in_channels
        self.out_channels = out_channels
        self.modes1 = modes1
        self.modes2 = modes2
        self.modes3 = modes3
        scale = 1.0 / (in_channels * out_channels)
        shape = (in_channels, out_channels, modes1, modes2, modes3)
        keys = jax.random.split(key, 8)
        # torch.rand(..., dtype=cfloat): real & imag each ~ U[0,1); deterministic here.
        self.weights = []  # list of (w_re, w_im), one per corner (weights1..4)
        for k in range(4):
            w_re = scale * jax.random.uniform(keys[2 * k], shape, jnp.float32)
            w_im = scale * jax.random.uniform(keys[2 * k + 1], shape, jnp.float32)
            self.weights.append((w_re, w_im))

        # --- precompute the packed, lane-padded weight tensors for the kernel ---
        ci, co = in_channels, out_channels
        m = modes1 * modes2 * modes3
        mpad = ((m + 127) // 128) * 128
        self._m = m
        self._mpad = mpad
        wr = jnp.stack([w[0] for w in self.weights], 0).reshape(4, ci, co, m)
        wi = jnp.stack([w[1] for w in self.weights], 0).reshape(4, ci, co, m)
        # rows r = 2*o + p :  p=0 multiplies into the real output row,
        #                     p=1 multiplies into the imaginary output row.
        wa = jnp.stack([wr, wi], axis=3).reshape(4, ci, 2 * co, m)    # * x_re
        wb = jnp.stack([-wi, wr], axis=3).reshape(4, ci, 2 * co, m)   # * x_im
        pad = ((0, 0), (0, 0), (0, 0), (0, mpad - m))
        self._wa = jnp.pad(wa, pad)
        self._wb = jnp.pad(wb, pad)

    def __call__(self, x):
        b, ci, d1, d2, d3 = x.shape
        m1, m2, m3 = self.modes1, self.modes2, self.modes3
        co = self.out_channels
        m, mpad = self._m, self._mpad

        # NOTE: assumes 2*m1 <= d1, 2*m2 <= d2 and m3 <= d3//2+1 (as in the
        # PyTorch module) so the four corner regions are valid and disjoint.
        x_ft = jnp.fft.rfftn(x, axes=(-3, -2, -1))  # complex64, (B,Ci,D1,D2,D3//2+1)

        corners = jnp.stack([
            x_ft[:, :, :m1, :m2, :m3],
            x_ft[:, :, -m1:, :m2, :m3],
            x_ft[:, :, :m1, -m2:, :m3],
            x_ft[:, :, -m1:, -m2:, :m3],
        ], axis=0)                                   # (4, B, Ci, m1, m2, m3)

        xc = corners.reshape(4, b, ci, m)
        x_pk = jnp.stack([jnp.real(xc), jnp.imag(xc)], axis=3).astype(jnp.float32)
        x_pk = jnp.pad(x_pk, ((0, 0), (0, 0), (0, 0), (0, 0), (0, mpad - m)))
        # x_pk: (4, B, Ci, 2, Mpad)

        out = spectral_corner_mul(x_pk, self._wa, self._wb)   # (4, B, 2*Co, Mpad)
        out = out[:, :, :, :m]
        out_re = out[:, :, 0::2, :]                            # (4, B, Co, M)
        out_im = out[:, :, 1::2, :]
        out_c = jax.lax.complex(out_re, out_im).reshape(4, b, co, m1, m2, m3)

        out_ft = jnp.zeros((b, co, d1, d2, d3 // 2 + 1), jnp.complex64)
        out_ft = out_ft.at[:, :, :m1, :m2, :m3].set(out_c[0])
        out_ft = out_ft.at[:, :, -m1:, :m2, :m3].set(out_c[1])
        out_ft = out_ft.at[:, :, :m1, -m2:, :m3].set(out_c[2])
        out_ft = out_ft.at[:, :, -m1:, -m2:, :m3].set(out_c[3])

        # TODO(synk): rfftn / irfftn have no Pallas equivalent; kept in plain JAX.
        return jnp.fft.irfftn(out_ft, s=(d1, d2, d3), axes=(-3, -2, -1))


def _reference_forward(layer, x):
    """Pure-JAX reference (mirrors the PyTorch forward) for validation."""
    b, ci, d1, d2, d3 = x.shape
    m1, m2, m3 = layer.modes1, layer.modes2, layer.modes3
    co = layer.out_channels
    x_ft = jnp.fft.rfftn(x, axes=(-3, -2, -1))
    ws = [jax.lax.complex(wr, wi) for wr, wi in layer.weights]
    out_ft = jnp.zeros((b, co, d1, d2, d3 // 2 + 1), jnp.complex64)
    mul = lambda inp, w: jnp.einsum('bixyz,ioxyz->boxyz', inp, w)
    out_ft = out_ft.at[:, :, :m1, :m2, :m3].set(mul(x_ft[:, :, :m1, :m2, :m3], ws[0]))
    out_ft = out_ft.at[:, :, -m1:, :m2, :m3].set(mul(x_ft[:, :, -m1:, :m2, :m3], ws[1]))
    out_ft = out_ft.at[:, :, :m1, -m2:, :m3].set(mul(x_ft[:, :, :m1, -m2:, :m3], ws[2]))
    out_ft = out_ft.at[:, :, -m1:, -m2:, :m3].set(mul(x_ft[:, :, -m1:, -m2:, :m3], ws[3]))
    return jnp.fft.irfftn(out_ft, s=(d1, d2, d3), axes=(-3, -2, -1))


if __name__ == "__main__":
    key = jax.random.PRNGKey(0)
    k_w, k_x = jax.random.split(key)

    B, Cin, Cout = 2, 4, 4
    D1 = D2 = D3 = 8
    modes1, modes2, modes3 = 4, 4, 3

    layer = SpectralConv3dPallas(Cin, Cout, modes1, modes2, modes3, k_w)
    x = jax.random.normal(k_x, (B, Cin, D1, D2, D3), jnp.float32)

    y = layer(x)
    y = jax.block_until_ready(y)

    y_ref = jax.block_until_ready(_reference_forward(layer, x))
    assert y.shape == (B, Cout, D1, D2, D3)
    assert jnp.max(jnp.abs(y - y_ref)) < 1e-4

    print("KERNEL_OK")
</pallas_src>

<mosaic_0001>
module attributes {stable_mosaic.version = 11 : i64} {
  func.func @_spectral_mul_kernel(%arg0: i32, %arg1: i32, %arg2: i32, %arg3: i32, %arg4: memref<1x1x4x2x128xf32, #tpu.memory_space<vmem>>, %arg5: memref<1x4x8x128xf32, #tpu.memory_space<vmem>>, %arg6: memref<1x4x8x128xf32, #tpu.memory_space<vmem>>, %arg7: memref<1x1x8x128xf32, #tpu.memory_space<vmem>>) attributes {dimension_semantics = [#tpu.dimension_semantics<parallel>, #tpu.dimension_semantics<parallel>, #tpu.dimension_semantics<parallel>, #tpu.dimension_semantics<parallel>], iteration_bounds = array<i64: 4, 1, 1, 2>, scalar_prefetch = 0 : i64, scratch_operands = 0 : i64, tpu.core_type = #tpu.core_type<tc>, window_params = [{transform_indices = @transform_0, window_bounds = array<i64: 1, 1, 4, 2, 128>}, {transform_indices = @transform_1, window_bounds = array<i64: 1, 4, 8, 128>}, {transform_indices = @transform_2, window_bounds = array<i64: 1, 4, 8, 128>}, {transform_indices = @transform_3, window_bounds = array<i64: 1, 1, 8, 128>}]} {
    %cst = arith.constant 0.000000e+00 : f32
    %0 = vector.broadcast %cst : f32 to vector<8x128xf32>
    %c0_i32 = arith.constant 0 : i32
    %c0 = arith.constant 0 : index
    %c0_0 = arith.constant 0 : index
    %1 = arith.index_cast %c0_i32 : i32 to index
    %c0_1 = arith.constant 0 : index
    %c0_2 = arith.constant 0 : index
    %2 = vector.load %arg4[%c0, %c0_0, %1, %c0_1, %c0_2] : memref<1x1x4x2x128xf32, #tpu.memory_space<vmem>>, vector<1x1x1x2x128xf32>
    %3 = vector.shape_cast %2 : vector<1x1x1x2x128xf32> to vector<2x128xf32>
    %4 = vector.extract_strided_slice %3 {offsets = [0, 0], sizes = [1, 128], strides = [1, 1]} : vector<2x128xf32> to vector<1x128xf32>
    %5 = vector.extract_strided_slice %3 {offsets = [1, 0], sizes = [1, 128], strides = [1, 1]} : vector<2x128xf32> to vector<1x128xf32>
    %c0_3 = arith.constant 0 : index
    %6 = arith.index_cast %c0_i32 : i32 to index
    %c0_4 = arith.constant 0 : index
    %c0_5 = arith.constant 0 : index
    %7 = vector.load %arg5[%c0_3, %6, %c0_4, %c0_5] : memref<1x4x8x128xf32, #tpu.memory_space<vmem>>, vector<1x1x8x128xf32>
    %8 = vector.shape_cast %7 : vector<1x1x8x128xf32> to vector<8x128xf32>
    %c0_6 = arith.constant 0 : index
    %9 = arith.index_cast %c0_i32 : i32 to index
    %c0_7 = arith.constant 0 : index
    %c0_8 = arith.constant 0 : index
    %10 = vector.load %arg6[%c0_6, %9, %c0_7, %c0_8] : memref<1x4x8x128xf32, #tpu.memory_space<vmem>>, vector<1x1x8x128xf32>
    %11 = vector.shape_cast %10 : vector<1x1x8x128xf32> to vector<8x128xf32>
    %12 = vector.broadcast %4 : vector<1x128xf32> to vector<8x128xf32>
    %13 = arith.mulf %12, %8 : vector<8x128xf32>
    %14 = arith.addf %0, %13 : vector<8x128xf32>
    %15 = vector.broadcast %5 : vector<1x128xf32> to vector<8x128xf32>
    %16 = arith.mulf %15, %11 : vector<8x128xf32>
    %17 = arith.addf %14, %16 : vector<8x128xf32>
    %c1_i32 = arith.constant 1 : i32
    %c0_9 = arith.constant 0 : index
    %c0_10 = arith.constant 0 : index
    %18 = arith.index_cast %c1_i32 : i32 to index
    %c0_11 = arith.constant 0 : index
    %c0_12 = arith.constant 0 : index
    %19 = vector.load %arg4[%c0_9, %c0_10, %18, %c0_11, %c0_12] : memref<1x1x4x2x128xf32, #tpu.memory_space<vmem>>, vector<1x1x1x2x128xf32>
    %20 = vector.shape_cast %19 : vector<1x1x1x2x128xf32> to vector<2x128xf32>
    %21 = vector.extract_strided_slice %20 {offsets = [0, 0], sizes = [1, 128], strides = [1, 1]} : vector<2x128xf32> to vector<1x128xf32>
    %22 = vector.extract_strided_slice %20 {offsets = [1, 0], sizes = [1, 128], strides = [1, 1]} : vector<2x128xf32> to vector<1x128xf32>
    %c0_13 = arith.constant 0 : index
    %23 = arith.index_cast %c1_i32 : i32 to index
    %c0_14 = arith.constant 0 : index
    %c0_15 = arith.constant 0 : index
    %24 = vector.load %arg5[%c0_13, %23, %c0_14, %c0_15] : memref<1x4x8x128xf32, #tpu.memory_space<vmem>>, vector<1x1x8x128xf32>
    %25 = vector.shape_cast %24 : vector<1x1x8x128xf32> to vector<8x128xf32>
    %c0_16 = arith.constant 0 : index
    %26 = arith.index_cast %c1_i32 : i32 to index
    %c0_17 = arith.constant 0 : index
    %c0_18 = arith.constant 0 : index
    %27 = vector.load %arg6[%c0_16, %26, %c0_17, %c0_18] : memref<1x4x8x128xf32, #tpu.memory_space<vmem>>, vector<1x1x8x128xf32>
    %28 = vector.shape_cast %27 : vector<1x1x8x128xf32> to vector<8x128xf32>
    %29 = vector.broadcast %21 : vector<1x128xf32> to vector<8x128xf32>
    %30 = arith.mulf %29, %25 : vector<8x128xf32>
    %31 = arith.addf %17, %30 : vector<8x128xf32>
    %32 = vector.broadcast %22 : vector<1x128xf32> to vector<8x128xf32>
    %33 = arith.mulf %32, %28 : vector<8x128xf32>
    %34 = arith.addf %31, %33 : vector<8x128xf32>
    %c2_i32 = arith.constant 2 : i32
    %c0_19 = arith.constant 0 : index
    %c0_20 = arith.constant 0 : index
    %35 = arith.index_cast %c2_i32 : i32 to index
    %c0_21 = arith.constant 0 : index
    %c0_22 = arith.constant 0 : index
    %36 = vector.load %arg4[%c0_19, %c0_20, %35, %c0_21, %c0_22] : memref<1x1x4x2x128xf32, #tpu.memory_space<vmem>>, vector<1x1x1x2x128xf32>
    %37 = vector.shape_cast %36 : vector<1x1x1x2x128xf32> to vector<2x128xf32>
    %38 = vector.extract_strided_slice %37 {offsets = [0, 0], sizes = [1, 128], strides = [1, 1]} : vector<2x128xf32> to vector<1x128xf32>
    %39 = vector.extract_strided_slice %37 {offsets = [1, 0], sizes = [1, 128], strides = [1, 1]} : vector<2x128xf32> to vector<1x128xf32>
    %c0_23 = arith.constant 0 : index
    %40 = arith.index_cast %c2_i32 : i32 to index
    %c0_24 = arith.constant 0 : index
    %c0_25 = arith.constant 0 : index
    %41 = vector.load %arg5[%c0_23, %40, %c0_24, %c0_25] : memref<1x4x8x128xf32, #tpu.memory_space<vmem>>, vector<1x1x8x128xf32>
    %42 = vector.shape_cast %41 : vector<1x1x8x128xf32> to vector<8x128xf32>
    %c0_26 = arith.constant 0 : index
    %43 = arith.index_cast %c2_i32 : i32 to index
    %c0_27 = arith.constant 0 : index
    %c0_28 = arith.constant 0 : index
    %44 = vector.load %arg6[%c0_26, %43, %c0_27, %c0_28] : memref<1x4x8x128xf32, #tpu.memory_space<vmem>>, vector<1x1x8x128xf32>
    %45 = vector.shape_cast %44 : vector<1x1x8x128xf32> to vector<8x128xf32>
    %46 = vector.broadcast %38 : vector<1x128xf32> to vector<8x128xf32>
    %47 = arith.mulf %46, %42 : vector<8x128xf32>
    %48 = arith.addf %34, %47 : vector<8x128xf32>
    %49 = vector.broadcast %39 : vector<1x128xf32> to vector<8x128xf32>
    %50 = arith.mulf %49, %45 : vector<8x128xf32>
    %51 = arith.addf %48, %50 : vector<8x128xf32>
    %c3_i32 = arith.constant 3 : i32
    %c0_29 = arith.constant 0 : index
    %c0_30 = arith.constant 0 : index
    %52 = arith.index_cast %c3_i32 : i32 to index
    %c0_31 = arith.constant 0 : index
    %c0_32 = arith.constant 0 : index
    %53 = vector.load %arg4[%c0_29, %c0_30, %52, %c0_31, %c0_32] : memref<1x1x4x2x128xf32, #tpu.memory_space<vmem>>, vector<1x1x1x2x128xf32>
    %54 = vector.shape_cast %53 : vector<1x1x1x2x128xf32> to vector<2x128xf32>
    %55 = vector.extract_strided_slice %54 {offsets = [0, 0], sizes = [1, 128], strides = [1, 1]} : vector<2x128xf32> to vector<1x128xf32>
    %56 = vector.extract_strided_slice %54 {offsets = [1, 0], sizes = [1, 128], strides = [1, 1]} : vector<2x128xf32> to vector<1x128xf32>
    %c0_33 = arith.constant 0 : index
    %57 = arith.index_cast %c3_i32 : i32 to index
    %c0_34 = arith.constant 0 : index
    %c0_35 = arith.constant 0 : index
    %58 = vector.load %arg5[%c0_33, %57, %c0_34, %c0_35] : memref<1x4x8x128xf32, #tpu.memory_space<vmem>>, vector<1x1x8x128xf32>
    %59 = vector.shape_cast %58 : vector<1x1x8x128xf32> to vector<8x128xf32>
    %c0_36 = arith.constant 0 : index
    %60 = arith.index_cast %c3_i32 : i32 to index
    %c0_37 = arith.constant 0 : index
    %c0_38 = arith.constant 0 : index
    %61 = vector.load %arg6[%c0_36, %60, %c0_37, %c0_38] : memref<1x4x8x128xf32, #tpu.memory_space<vmem>>, vector<1x1x8x128xf32>
    %62 = vector.shape_cast %61 : vector<1x1x8x128xf32> to vector<8x128xf32>
    %63 = vector.broadcast %55 : vector<1x128xf32> to vector<8x128xf32>
    %64 = arith.mulf %63, %59 : vector<8x128xf32>
    %65 = arith.addf %51, %64 : vector<8x128xf32>
    %66 = vector.broadcast %56 : vector<1x128xf32> to vector<8x128xf32>
    %67 = arith.mulf %66, %62 : vector<8x128xf32>
    %68 = arith.addf %65, %67 : vector<8x128xf32>
    %c4_i32 = arith.constant 4 : i32
    %c0_39 = arith.constant 0 : index
    %c0_40 = arith.constant 0 : index
    %c0_41 = arith.constant 0 : index
    %c0_42 = arith.constant 0 : index
    %69 = vector.load %arg7[%c0_39, %c0_40, %c0_41, %c0_42] : memref<1x1x8x128xf32, #tpu.memory_space<vmem>>, vector<1x1x8x128xf32>
    %70 = vector.shape_cast %69 : vector<1x1x8x128xf32> to vector<8x128xf32>
    %71 = vector.shape_cast %68 : vector<8x128xf32> to vector<1x1x8x128xf32>
    tpu.vector_store %arg7[%c0_39, %c0_40, %c0_41, %c0_42], %71 {strides = array<i32>} : memref<1x1x8x128xf32, #tpu.memory_space<vmem>>, vector<1x1x8x128xf32>,
    return
  }
  func.func @transform_0(%arg0: i32, %arg1: i32, %arg2: i32, %arg3: i32) -> (i32, i32, i32, i32, i32) {
    %c0_i32 = arith.constant 0 : i32
    %c0_i32_0 = arith.constant 0 : i32
    %c0_i32_1 = arith.constant 0 : i32
    return %arg0, %arg3, %c0_i32, %c0_i32_0, %arg2 : i32, i32, i32, i32, i32
  }
  func.func @transform_1(%arg0: i32, %arg1: i32, %arg2: i32, %arg3: i32) -> (i32, i32, i32, i32) {
    %c0_i32 = arith.constant 0 : i32
    %c0_i32_0 = arith.constant 0 : i32
    return %arg0, %c0_i32, %arg1, %arg2 : i32, i32, i32, i32
  }
  func.func @transform_2(%arg0: i32, %arg1: i32, %arg2: i32, %arg3: i32) -> (i32, i32, i32, i32) {
    %c0_i32 = arith.constant 0 : i32
    %c0_i32_0 = arith.constant 0 : i32
    return %arg0, %c0_i32, %arg1, %arg2 : i32, i32, i32, i32
  }
  func.func @transform_3(%arg0: i32, %arg1: i32, %arg2: i32, %arg3: i32) -> (i32, i32, i32, i32) {
    %c0_i32 = arith.constant 0 : i32
    return %arg0, %arg3, %arg1, %arg2 : i32, i32, i32, i32
  }
}

</mosaic_0001>

<bundles_post_ra>
// kernel: tpu_custom_call.1
= control target key start
LH: loop header
LB: loop body
LE: loop exit
PB: predicated region body
PF: predicated region fallthrough
CT: control target
= control target key end

     0   :  { %s1178_s0 = inlined_call_operand.hbm [shape: f32[4,2,4,2,128], index: 0, kind: input, shape index: {}]   ;;  %s1179_s1 = inlined_call_operand.hbm [shape: f32[4,4,8,128], index: 1, kind: input, shape index: {}]   ;;  %s1180_s2 = inlined_call_operand.hbm [shape: f32[4,4,8,128], index: 2, kind: input, shape index: {}]   ;;  %s1181_s3 = inlined_call_operand.hbm [shape: f32[4,2,8,128], index: 3, kind: output, shape index: {}]  }
   0x1   :  { %1197 = sst [smem:[#allocation24_spill]] %s1179_s1 }
   0x2   :  { %1198 = sst [smem:[#allocation25_spill]] %s1180_s2 }
   0x3   :  { %1199 = sst [smem:[#allocation26_spill]] %s1181_s3 }
   0x4   :  { %8 = vsyncpa [#allocation3], 0 }
   0x5   :  { %10 = vsyncpa [#allocation3 + $0x1], 0 }
   0x6   :  { %11 = vsyncpa [#allocation6], 0 }
   0x7   :  { %13 = vsyncpa [#allocation6 + $0x1], 0 }
   0x8   :  { %14 = vsyncpa [#allocation4], 0 }
   0x9   :  { %16 = vsyncpa [#allocation4 + $0x1], 0  ;;  %s926_s12 = smov 0   ;;  %s928_s13 = smov 0  }
   0xa   :  { %s930_s14 = smov 0   ;;  %s932_s15 = smov 0  }
   0xb   :  { %s934_s16 = smov 0   ;;  %s936_s17 = smov 0  }
   0xc   :  { %s938_s18 = smov 0   ;;  %s940_s19 = smov 0  }
   0xd   :  { %s942_s20 = smov 0   ;;  %s944_s21 = smov 0  }
   0xe   :  { %s946_s22 = smov 0  }
   0xf LB: > { %1200 = sst [smem:[#allocation12_spill]] %s872_s15  ;;  %s980_s23 = sadd.s32 4294967295, %s900_s22   ;;  %s900_s22 = sphi %s946_s22, %s22_s22   ;;  %s896_s21 = sphi %s944_s21, %s1239_s21   ;;  %s892_s20 = sphi %s942_s20, %s1246_s20   ;;  %s888_s19 = sphi %s940_s19, %s1237_s19   ;;  %s884_s18 = sphi %s938_s18, %s1245_s18   ;;  %s880_s17 = sphi %s936_s17, %s1236_s17   ;;  %s876_s16 = sphi %s934_s16, %s1244_s16   ;;  %s872_s15 = sphi %s932_s15, %s1243_s15   ;;  %s868_s14 = sphi %s930_s14, %s1242_s14   ;;  %s864_s13 = sphi %s928_s13, %s1241_s13   ;;  %s860_s12 = sphi %s926_s12, %s1240_s12  }
  0x10   : > { %1201 = sst [smem:[#allocation13_spill]] %s880_s17  ;;  %s48_s24 = sadd.s32 1, %s896_s21 }
  0x11   : > { %1202 = sst [smem:[#allocation14_spill]] %s884_s18  ;;  %p67_p0 = scmp.eq.s32.totalorder %s900_s22, 0 }
  0x12   : > { %1203 = sst [smem:[#allocation15_spill]] %s888_s19  ;;  %p73_p1 = scmp.eq.s32.totalorder %s980_s23, 0 }
  0x13   : > { %1204 = sst [smem:[#allocation16_spill]] %s896_s21  ;;  %p96_p2 = scmp.ne.s32.totalorder %s868_s14, %s864_s13 }
  0x14   : > { %p102_p3 = scmp.ne.s32.totalorder %s864_s13, %s860_s12  ;;  %p1183_p5 = scmp.lt.s32.totalorder %s900_s22, 8 }
  0x15   : > { %p991_p4 = por %p96_p2, %p67_p0  ;;  %s213_s28 = sand.u32 1, %s900_s22  }
  0x16   : > { %p998_p6 = por %p102_p3, %p73_p1  ;;  %s215_s29 = sand.u32 1, %s868_s14  }
  0x17   : > { %s541_s30 = sshll.u32 %s215_s29, 5  ;;  %s566_s4 = sshll.u32 %s896_s21, 5 }
  0x18   : > { %s1206_s27 = scalar_select %p998_p6, 1, 0 }
  0x19   : > { %s1208_s1 = sld [smem:[#allocation24_spill]]  ;;  %s217_s9 = scalar_lea.vmem [#allocation5], %s541_s30 }
  0x1a   : > { %1207 = sst [smem:[#allocation17_spill]] %s1206_s27  ;;  %s227_s10 = sshll.u32 %s217_s9, 4  ;;  %s228_s10 = int_to_ptr.vmem [resolvable:$true] %s227_s10 }
  0x1b   : > { %p1012_p7 = pnand %p1183_p5, %p991_p4  ;;  %s1210_s2 = sld [smem:[#allocation25_spill]] }
  0x1c   : > { %s1019_s6 = scalar_lea.sflag [#allocation6], %s213_s28  ;;  %s1184_s26 = smov 8  }
  0x1d   : > { %s241_s12 = scalar_lea.vmem [#allocation7], %s541_s30  ;;  %p547_p8 = scmp.ge.s32.totalorder %s900_s22, 1 }
  0x1e   : > { %s1027_s28 = sshll.u32 %s241_s12, 4  ;;  %p259_p9 = scmp.lt.s32.totalorder %s900_s22, 9 }
  0x1f   : > { %s224_s7 = scalar_lea.hbm %s1208_s1, %s566_s4  ;;  %1211 = sst [smem:[#allocation18_spill]] %s1027_s28 }
  0x20   : > { %s225_s8 = sshll.u32 %s224_s7, 4  ;;  %s1182_s7 = smov 128   ;;  %s226_s8 = int_to_ptr.hbm [resolvable:$true] %s225_s8 }
  0x21   : > { %s248_s5 = scalar_lea.hbm %s1210_s2, %s566_s4  ;;  %p1034_p10 = pnand %p547_p8, %p259_p9 }
  0x22   : > { %582 = dma.hbm_to_vmem [thread:$0]  (!%p1012_p7), %s226_s8, 512, %s228_s10, %s1019_s6, %s1182_s7, %s1182_s7, %s1184_s26  }
  0x23   : > { %s249_s9 = sshll.u32 %s248_s5, 4  ;;  %s534_s8 = sadd.s32 4294967294, %s900_s22   ;;  %s1029_s9 = int_to_ptr.hbm [resolvable:$true] %s249_s9 }
  0x24   : > { %s37_s10 = sadd.s32 1, %s892_s20  ;;  %s59_s29 = sadd.s32 1, %s880_s17 }
  0x25   : > { %p38_p11 = scmp.ge.s32.totalorder %s37_s10, 2  ;;  %p66_p12 = scmp.ne.s32.totalorder %s880_s17, %s876_s16 }
  0x26   : > { %p72_p13 = scmp.ne.s32.totalorder %s876_s16, %s872_s15  ;;  %p162_p2 = scmp.eq.s32.totalorder %s980_s23, 7 }
  0x27   : > { %s1248_s10 = smov (%p38_p11, %s37_s10), 0  ;;  %s1250_s24 = smov (!%p38_p11, %s48_s24), %s896_s21 }
  0x28   : > { %1213 = sst [smem:[#allocation19_spill]] %s1248_s10  ;;  %s53_s30 = ssub.s32 %s892_s20, %s1248_s10 }
  0x29   : > { %p1055_p3 = por %p67_p0, %p66_p12  ;;  %p50_p4 = scmp.ge.s32.totalorder %s1250_s24, 4 }
  0x2a   : > { %p1061_p8 = por %p73_p1, %p72_p13  ;;  %p1065_p9 = por %p162_p2, %p66_p12 }
  0x2b   : > { %p168_p11 = scmp.eq.s32.totalorder %s534_s8, 7  ;;  %s1252_s24 = smov (%p50_p4, %s1250_s24), 0 }
  0x2c   : > { %s1216_s7 = scalar_select %p1065_p9, 1, 0 }
  0x2d   : > { %1218 = sst [smem:[#allocation21_spill]] %s1252_s24  ;;  %p1071_p5 = por %p168_p11, %p72_p13 }
  0x2e   : > { %1217 = sst [smem:[#allocation20_spill]] %s1216_s7  ;;  %s188_s28 = sand.u32 1, %s880_s17  }
  0x2f   : > { %s1219_s26 = scalar_select %p1071_p5, 1, 0 }
  0x30   : > { %s52_s25 = ssub.s32 %s896_s21, %s1252_s24  ;;  %s537_s2 = sshll.u32 %s188_s28, 3 }
  0x31   : > { %1220 = sst [smem:[#allocation22_spill]] %s1219_s26  ;;  %s54_s1 = sor.u32 %s53_s30, %s52_s25 }
  0x32   : > { %p87_p0 = scmp.eq.s32.totalorder %s52_s25, 0  ;;  %p57_p1 = scmp.eq.s32.totalorder %s54_s1, 0 }
  0x33   : > { %s1221_s10 = sadd.s32 1, %s868_s14  ;;  %s1223_s8 = sld [smem:[#allocation18_spill]] }
  0x34   : > { %s1081_s15 = scalar_select %p87_p0, %s868_s14, %s1221_s10  }
  0x35   : > { %s1084_s7 = scalar_select %p57_p1, %s880_s17, %s59_s29  }
  0x36   : > { %s538_s3 = sshll.u32 %s892_s20, 2  ;;  %s539_s18 = sshll.u32 %s896_s21, 3 }
  0x37   : > { %1222 = sst [smem:[#allocation23_spill]] %s1084_s7  ;;  %s192_s26 = scalar_lea.vmem [#allocation2], %s537_s2 }
  0x38   : > { %s203_s19 = sshll.u32 %s192_s26, 4  ;;  %s198_s27 = sadd.s32 %s539_s18, %s538_s3  ;;  %s204_s19 = int_to_ptr.vmem [resolvable:$true] %s203_s19 }
  0x39   : > { %s540_s24 = sshll.u32 %s198_s27, 1  ;;  %p1224_p12 = scmp.lt.s32.totalorder %s900_s22, 8 }
  0x3a   : > { %s200_s10 = scalar_lea.hbm %s1178_s0, %s540_s24  ;;  %s189_s30 = scalar_lea.sflag [#allocation3], %s188_s28 }
  0x3b   : > { %p577_p13 = pnand %p1224_p12, %p1055_p3  ;;  %s201_s29 = sshll.u32 %s200_s10, 4  ;;  %s202_s29 = int_to_ptr.hbm [resolvable:$true] %s201_s29 }
  0x3c   : > { %s904_s7 = smov 32   ;;  %s905_s17 = smov 2  }
  0x3d   : > { %579 = dma.hbm_to_vmem [thread:$0]  (!%p577_p13), %s202_s29, 128, %s204_s19, %s189_s30, %s904_s7, %s904_s7, %s905_s17  }
  0x3e   : > { %s1225_s21 = smov 8   ;;  %s1226_s2 = smov 128  }
  0x3f   : > { %s1227_s3 = int_to_ptr.vmem [resolvable:$true] %s1223_s8  ;;  %263 = sbr.rel (%p1034_p10) target bundleno = 96 (0x60), region = 32 }
  0x40   : > { %585 = dma.hbm_to_vmem [thread:$0]  (!%p1012_p7), %s1029_s9, 512, %s1227_s3, %s1019_s6, %s1226_s2, %s1226_s2, %s1225_s21  }
  0x41   : > { %s1107_s18 = sand.u32 (!%p1034_p10), 1, %s876_s16  }
  0x42   : > { %s548_s24 = sshll.u32 (!%p1034_p10), %s1107_s18, 3  ;;  %s266_s27 = scalar_lea.sflag (!%p1034_p10), [#allocation3], %s1107_s18 }
  0x43   : > { %s269_s17 = scalar_lea.vmem (!%p1034_p10), [#allocation2], %s548_s24 }
  0x44   : > { %847 = dma.done.wait (%p1061_p8), %s266_s27, 128  }
  0x45   : > { %849 = vsyncadd (%p1061_p8), %s266_s27, 4294967168  ;;  %s275_s21 = sand.u32 1, %s980_s23   ;;  %s277_s11 = sand.u32 1, %s864_s13  }
  0x46   : > { %s549_s6 = sshll.u32 %s277_s11, 5  ;;  %s276_s7 = scalar_lea.sflag [#allocation6], %s275_s21 }
  0x47   : > { %s279_s26 = scalar_lea.vmem [#allocation5], %s549_s6 }
  0x48   : > { %851 = dma.done.wait (%p998_p6), %s276_s7, 1024  }
  0x49   : > { %853 = vsyncadd (%p998_p6), %s276_s7, 4294966272  ;;  %s1229_s9 = sld [smem:[#allocation15_spill]]  ;;  %v323_v0 = vld [vmem:[%s269_s17] sm:$0x3]  ;;  %v324_v1 = vld [vmem:[%s279_s26] sm:$0xff]  ;;  %s289_s28 = scalar_lea.vmem [#allocation7], %s549_s6 }
  0x4a   : > { %v325_v2 = vld [vmem:[%s289_s28] sm:$0xff]  ;;  %v326_v3 = vperm.slane %v323_v0, 0  ;;  %v329_v4 = vperm.slane %v323_v0, 1  ;;  %v552_v5 = vld [vmem:[%s269_s17 + $0x2] sm:$0x3]  ;;  %s1230_s4 = sld [smem:[#allocation14_spill]] }
  0x4b   : > { %v553_v6 = vld [vmem:[%s279_s26 + $0x8] sm:$0xff]  ;;  %v338_v8 = vperm.slane %v552_v5, 0  ;;  %v341_v9 = vperm.slane %v552_v5, 1  ;;  %v555_v10 = vld [vmem:[%s269_s17 + $0x4] sm:$0x3]  ;;  %s1231_s25 = sld [smem:[#allocation26_spill]] }
  0x4c   : > { %v554_v7 = vld [vmem:[%s289_s28 + $0x8] sm:$0xff]  ;;  %v327_v11 = vmul.f32 %v326_v3, %v324_v1  ;;  %v330_v12 = vmul.f32 %v329_v4, %v325_v2  ;;  %v350_v13 = vperm.slane %v555_v10, 0  ;;  %v556_v15 = vld [vmem:[%s279_s26 + $0x10] sm:$0xff]  ;;  %v353_v19 = vperm.slane %v555_v10, 1  ;;  %v559_v24 = vld [vmem:[%s279_s26 + $0x18] sm:$0xff]  ;;  %s322_s30 = scalar_lea.vmem [#allocation8], %s548_s24 }
  0x4d   : > { %v339_v14 = vmul.f32 %v553_v6, %v338_v8  ;;  %v558_v16 = vld [vmem:[%s269_s17 + $0x6] sm:$0x3]  ;;  %v342_v18 = vmul.f32 %v554_v7, %v341_v9  ;;  %s386_s2 = sshll.u32 %s322_s30, 4  ;;  %s370_s27 = scalar_lea.sflag [#allocation4], %s1107_s18  ;;  %s387_s2 = int_to_ptr.vmem [resolvable:$true] %s386_s2 }
  0x4e   : > { %v331_v17 = vadd.f32 %v330_v12, %v327_v11  ;;  %v557_v20 = vld [vmem:[%s289_s28 + $0x10] sm:$0xff]  ;;  %v351_v22 = vmul.f32 %v556_v15, %v350_v13  ;;  %v362_v23 = vperm.slane %v558_v16, 0  ;;  %v365_v27 = vperm.slane %v558_v16, 1  ;;  %v560_v28 = vld [vmem:[%s289_s28 + $0x18] sm:$0xff] }
  0x4f   : > { %s562_s23 = sshll.u32 %s1229_s9, 1  ;;  %v354_v26 = vmul.f32 %v557_v20, %v353_v19 }
  0x50   : > { %s382_s5 = sadd.s32 %s1230_s4, %s562_s23  ;;  %v340_v21 = vadd.f32 %v339_v14, %v331_v17  ;;  %v363_v30 = vmul.f32 %v559_v24, %v362_v23  ;;  %v366_v32 = vmul.f32 %v560_v28, %v365_v27 }
  0x51   : > { %s563_s12 = sshll.u32 %s382_s5, 3  ;;  %s794_s6 = scalar_lea.hbm %s1231_s25, 64 }
  0x52   : > { %v343_v25 = vadd.f32 %v342_v18, %v340_v21  ;;  %s384_s10 = scalar_lea.hbm %s1231_s25, %s563_s12 }
  0x53   : > { %s388_s3 = sshll.u32 %s384_s10, 4  ;;  %s389_s3 = int_to_ptr.hbm [resolvable:$true] %s388_s3 }
  0x54   : > { %v352_v29 = vadd.f32 %v351_v22, %v343_v25  ;;  %s788_s17 = sshra.s32 %s389_s3, 4  ;;  %s789_s17 = int_to_ptr.hbm [resolvable:$true] %s788_s17 }
  0x55   : > { %s790_s19 = scalar_lea.hbm %s789_s17, 8  ;;  %p795_p2 = scmp.lt.s32.totalorder %s789_s17, %s1231_s25 }
  0x56   : > { %v355_v31 = vadd.f32 %v354_v26, %v352_v29  ;;  %p791_p6 = scmp.ne.s32.totalorder %s789_s17, %s790_s19  ;;  %p796_p3 = scmp.lt.s32.totalorder %s794_s6, %s790_s19 }
  0x58   : > { %v364_v33 = vadd.f32 %v363_v30, %v355_v31  ;;  %p792_p7 = pnand %p791_p6, %p1065_p9  ;;  %p797_p4 = por %p796_p3, %p795_p2 }
  0x5a   : > { %v367_v34 = vadd.f32 %v366_v32, %v364_v33  ;;  %p793_p10 = pneg %p792_p7 }
  0x5c   : > { %368 = vst [vmem:[%s322_s30] sm:$0xff] %v367_v34  ;;  %p798_p8 = pnand %p797_p4, %p793_p10 }
  0x5e   : > { %801 = shalt.err (!%p798_p8)
}
  0x5f   : > { %574 = dma.vmem_to_hbm [thread:$0]  (%p1065_p9), %s387_s2, 128, %s389_s3, %s370_s27  }
  0x60 PF: > { %s1233_s18 = sld [smem:[#allocation12_spill]]  ;;  %p591_p11 = scmp.ge.s32.totalorder %s900_s22, 2 }
  0x62   : > { %p587_p0 = pnand %p591_p11, %p1071_p5 }
  0x64   : > { %p588_p1 = pneg %p587_p0 }
  0x66   : > { %s400_s9 = sand.u32 1, %s1233_s18  }
  0x67   : > { %s401_s28 = scalar_lea.sflag [#allocation4], %s400_s9 }
  0x68   : > { %855 = dma.done.wait (%p588_p1), %s401_s28, 128  }
  0x69   : > { %857 = vsyncadd (%p588_p1), %s401_s28, 4294967168  ;;  %s22_s22 = sadd.s32 1, %s900_s22   ;;  %s1235_s4 = sld [smem:[#allocation13_spill]] }
  0x6a   : > { %p19_p12 = scmp.ge.s32.totalorder %s22_s22, 10   ;;  %s1236_s17 = sld [smem:[#allocation23_spill]] }
  0x6b   : > { %s1237_s19 = sld [smem:[#allocation16_spill]]  ;;  %s1240_s12 = smov %s864_s13 }
  0x6c   : > { %s1238_s23 = sld [smem:[#allocation19_spill]]  ;;  %s1241_s13 = smov %s868_s14 }
  0x6d   : > { %s1239_s21 = sld [smem:[#allocation21_spill]]  ;;  %s1242_s14 = smov %s1081_s15 }
  0x6e   : > { %s1243_s15 = smov %s876_s16  ;;  %s1245_s18 = smov %s892_s20 }
  0x6f   : > { %s1244_s16 = smov %s1235_s4  ;;  %21 = sbr.rel (!%p19_p12) target bundleno = 15 (0xf), region = 110 }
  0x72   : > { %s1246_s20 = smov %s1238_s23 }
  0x74   :  { %407 = vsyncpa [#allocation3], 1 }
  0x75   :  { %409 = vsyncpa [#allocation3 + $0x1], 1 }
  0x76   :  { %410 = vsyncpa [#allocation6], 1 }
  0x77   :  { %412 = vsyncpa [#allocation6 + $0x1], 1 }
  0x78   :  { %413 = vsyncpa [#allocation4], 1 }
  0x79   :  { %415 = vsyncpa [#allocation4 + $0x1], 1 }

</bundles_post_ra>
